<compile_context>
chip_gen: v7x
topology: tpu7x:2x2x1
jax: 0.10.0
libtpu: 0.0.40
codegen_flags: <defaults>
</compile_context>

<pallas_src>
import jax
import jax.numpy as jnp
from jax.experimental import pallas as pl
from jax.experimental.pallas import tpu as pltpu


def _focus_conv_kernel(w_ref, b_ref, z_ref, o_ref):
    # w_ref: [O, K]   b_ref: [O, 1]   z_ref: [K, TM]   o_ref: [O, TM]
    acc = jnp.dot(w_ref[...], z_ref[...], preferred_element_type=jnp.float32)
    o_ref[...] = (acc + b_ref[...]).astype(o_ref.dtype)


def _pick_pixel_tile(M, K, O, in_itemsize, out_itemsize, *, tm_target=32768,
                     block_budget_bytes=24 * 1024 * 1024):
    """Pixel (lane) tile size.

    Largest tile that (a) keeps the double-buffered in+out blocks under
    `block_budget_bytes` (v7x: 64 MiB physical VMEM), (b) is <= tm_target, and
    (c) when tiling is needed, is a multiple of 128 that preferably divides M
    exactly (no masked vst tail tile).
    """
    params_bytes = (O * K + O) * 4
    per_lane = 2 * (K * in_itemsize + O * out_itemsize)   # double-buffered
    tm_budget = max(128, (block_budget_bytes - params_bytes) // per_lane)
    tm_cap = int(min(tm_target, tm_budget))
    if M <= tm_cap:
        return M          # single full-extent tile (legal even if M < 128)
    tm_cap = (tm_cap // 128) * 128
    for tm in range(tm_cap, 0, -128):
        if M % tm == 0:
            return tm     # divides M exactly -> unmasked stores on every step
    return tm_cap         # fall back: masked trailing tile (store masks it)


def _conv1x1_pixels_on_lanes(z, w_mat, b_col, out_dtype):
    """z: [N, K, M] -> y: [N, O, M] with y[n] = w_mat @ z[n] + bias."""
    N, K, M = z.shape
    O = w_mat.shape[0]
    out_itemsize = jnp.dtype(out_dtype).itemsize
    tm = _pick_pixel_tile(M, K, O, z.dtype.itemsize, out_itemsize)
    grid = (pl.cdiv(M, tm), N)   # pixel tiles first: v7x megacore busy at N=1

    # Scoped-VMEM limit: double-buffered blocks + resident params + headroom,
    # clamped to [32 MiB, 48 MiB] (v5e default is 16 MiB; stay under v7x's
    # 64 MiB physical VMEM).
    block_bytes = 2 * tm * (K * z.dtype.itemsize + O * out_itemsize)
    vmem_limit = int(min(48 * 1024 * 1024,
                         max(32 * 1024 * 1024,
                             block_bytes + (O * K + O) * 4 + 8 * 1024 * 1024)))

    cost = pl.CostEstimate(
        flops=2 * N * O * K * M,
        transcendentals=0,
        bytes_accessed=(N * K * M * z.dtype.itemsize
                        + N * O * M * out_itemsize
                        + (O * K + O) * 4),
    )

    return pl.pallas_call(
        _focus_conv_kernel,
        out_shape=jax.ShapeDtypeStruct((N, O, M), out_dtype),
        grid_spec=pltpu.PrefetchScalarGridSpec(
            num_scalar_prefetch=0,
            grid=grid,
            in_specs=[
                pl.BlockSpec((O, K), lambda m, n: (0, 0)),          # resident weight
                pl.BlockSpec((O, 1), lambda m, n: (0, 0)),          # resident bias
                pl.BlockSpec((None, K, tm), lambda m, n: (n, 0, m)),  # pixel tile
            ],
            out_specs=pl.BlockSpec((None, O, tm), lambda m, n: (n, 0, m)),
        ),
        compiler_params=pltpu.CompilerParams(
            dimension_semantics=("parallel", "parallel"),
            vmem_limit_bytes=vmem_limit,
        ),
        cost_estimate=cost,
    )(w_mat, b_col, z)


def focus_forward(x, weight, bias, *, out_dtype=None):
    """Focus forward pass.

    x:      [N, C, H, W]  float32 (NCHW, like PyTorch)
    weight: [O, 4*C, 1, 1] (PyTorch Conv2d weight layout)
    bias:   [O]
    out_dtype: optional output dtype (e.g. jnp.bfloat16 to halve writeback
               traffic); defaults to x.dtype.
    returns [N, O, H//2, W//2]
    """
    N, C, H, W = x.shape
    O = weight.shape[0]
    if (H % 2) or (W % 2):
        raise ValueError(f"Focus requires even spatial dims, got H={H}, W={W}")
    H2, W2 = H // 2, W // 2
    K = 4 * C
    M = H2 * W2
    out_dtype = x.dtype if out_dtype is None else out_dtype

    # Space-to-depth in exact torch.cat order.  Channel-major NCHW order is
    # kept, so the reshape to [N, K, M] is metadata-only, and XLA fuses the
    # four strided slices + concat into a single copy pass.
    # TODO(synk): fuse this into the Pallas kernel (see header) once a cheap
    # lane-stride-2 deinterleave lowering is available.
    z = jnp.concatenate(
        [
            x[:, :, 0::2, 0::2],
            x[:, :, 1::2, 0::2],
            x[:, :, 0::2, 1::2],
            x[:, :, 1::2, 1::2],
        ],
        axis=1,
    ).reshape(N, K, M)                                 # [N, 4C, H2*W2]

    w_mat = weight.reshape(O, K)                       # [O, K]
    b_col = bias.reshape(O, 1)                         # [O, 1]

    y = _conv1x1_pixels_on_lanes(z, w_mat, b_col, out_dtype)   # [N, O, M]
    return y.reshape(N, O, H2, W2)                     # metadata-only reshape


if __name__ == "__main__":
    key = jax.random.PRNGKey(0)
    k_x, k_w, k_b = jax.random.split(key, 3)

    N, C, H, W = 2, 4, 16, 16
    out_channels = 32

    x = jax.random.normal(k_x, (N, C, H, W), dtype=jnp.float32)
    # Conv2d(4*C, out_channels, kernel_size=1, bias=True) parameters.
    weight = 0.1 * jax.random.normal(k_w, (out_channels, 4 * C, 1, 1),
                                     dtype=jnp.float32)
    bias = 0.05 * jax.random.normal(k_b, (out_channels,), dtype=jnp.float32)

    y = jax.jit(focus_forward)(x, weight, bias)
    y = jax.block_until_ready(y)

    # Pure-JAX reference for sanity.
    z_ref = jnp.concatenate(
        [x[:, :, ::2, ::2], x[:, :, 1::2, ::2],
         x[:, :, ::2, 1::2], x[:, :, 1::2, 1::2]], axis=1)
    y_ref = jnp.einsum("nchw,oc->nohw", z_ref,
                       weight.reshape(out_channels, 4 * C))
    y_ref = y_ref + bias.reshape(1, out_channels, 1, 1)

    assert y.shape == (N, out_channels, H // 2, W // 2), y.shape
    assert jnp.allclose(y, y_ref, atol=1e-4, rtol=1e-4), float(
        jnp.max(jnp.abs(y - y_ref)))

    print("KERNEL_OK")
</pallas_src>

<mosaic_0001>
module attributes {stable_mosaic.version = 11 : i64} {
  func.func @_focus_conv_kernel(%arg0: i32, %arg1: i32, %arg2: memref<32x16xf32, #tpu.memory_space<vmem>>, %arg3: memref<32x1xf32, #tpu.memory_space<vmem>>, %arg4: memref<1x16x64xf32, #tpu.memory_space<vmem>>, %arg5: memref<1x32x64xf32, #tpu.memory_space<vmem>>) attributes {dimension_semantics = [#tpu.dimension_semantics<parallel>, #tpu.dimension_semantics<parallel>], iteration_bounds = array<i64: 1, 2>, scalar_prefetch = 0 : i64, scratch_operands = 0 : i64, tpu.core_type = #tpu.core_type<tc>, window_params = [{pipeline_mode = #tpu.pipeline_mode<synchronous>, transform_indices = @transform_0, window_bounds = array<i64: 32, 16>}, {pipeline_mode = #tpu.pipeline_mode<synchronous>, transform_indices = @transform_1, window_bounds = array<i64: 32, 1>}, {transform_indices = @transform_2, window_bounds = array<i64: 1, 16, 64>}, {transform_indices = @transform_3, window_bounds = array<i64: 1, 32, 64>}]} {
    %c0 = arith.constant 0 : index
    %c0_0 = arith.constant 0 : index
    %0 = vector.load %arg2[%c0, %c0_0] : memref<32x16xf32, #tpu.memory_space<vmem>>, vector<32x16xf32>
    %c0_1 = arith.constant 0 : index
    %c0_2 = arith.constant 0 : index
    %c0_3 = arith.constant 0 : index
    %1 = vector.load %arg4[%c0_1, %c0_2, %c0_3] : memref<1x16x64xf32, #tpu.memory_space<vmem>>, vector<1x16x64xf32>
    %2 = vector.shape_cast %1 : vector<1x16x64xf32> to vector<16x64xf32>
    %cst = arith.constant dense<0.000000e+00> : vector<32x64xf32>
    %3 = tpu.matmul %0, %2, %cst {dimension_numbers = #tpu.dot_dimension_numbers<[1], [0], [0], [1], [0, 0, 1, 1], [], []>} : vector<32x16xf32>, vector<16x64xf32>, vector<32x64xf32> -> vector<32x64xf32>
    %c0_4 = arith.constant 0 : index
    %c0_5 = arith.constant 0 : index
    %4 = vector.load %arg3[%c0_4, %c0_5] : memref<32x1xf32, #tpu.memory_space<vmem>>, vector<32x1xf32>
    %5 = vector.broadcast %4 : vector<32x1xf32> to vector<32x64xf32>
    %6 = arith.addf %3, %5 : vector<32x64xf32>
    %c0_6 = arith.constant 0 : index
    %c0_7 = arith.constant 0 : index
    %c0_8 = arith.constant 0 : index
    %7 = vector.load %arg5[%c0_6, %c0_7, %c0_8] : memref<1x32x64xf32, #tpu.memory_space<vmem>>, vector<1x32x64xf32>
    %8 = vector.shape_cast %7 : vector<1x32x64xf32> to vector<32x64xf32>
    %9 = vector.shape_cast %6 : vector<32x64xf32> to vector<1x32x64xf32>
    tpu.vector_store %arg5[%c0_6, %c0_7, %c0_8], %9 {strides = array<i32>} : memref<1x32x64xf32, #tpu.memory_space<vmem>>, vector<1x32x64xf32>,
    return
  }
  func.func @transform_0(%arg0: i32, %arg1: i32) -> (i32, i32) {
    %c0_i32 = arith.constant 0 : i32
    %c0_i32_0 = arith.constant 0 : i32
    %c0_i32_1 = arith.constant 0 : i32
    return %c0_i32, %c0_i32_0 : i32, i32
  }
  func.func @transform_1(%arg0: i32, %arg1: i32) -> (i32, i32) {
    %c0_i32 = arith.constant 0 : i32
    %c0_i32_0 = arith.constant 0 : i32
    %c0_i32_1 = arith.constant 0 : i32
    return %c0_i32, %c0_i32_0 : i32, i32
  }
  func.func @transform_2(%arg0: i32, %arg1: i32) -> (i32, i32, i32) {
    %c0_i32 = arith.constant 0 : i32
    %c0_i32_0 = arith.constant 0 : i32
    return %arg1, %c0_i32, %arg0 : i32, i32, i32
  }
  func.func @transform_3(%arg0: i32, %arg1: i32) -> (i32, i32, i32) {
    %c0_i32 = arith.constant 0 : i32
    %c0_i32_0 = arith.constant 0 : i32
    return %arg1, %c0_i32, %arg0 : i32, i32, i32
  }
}

</mosaic_0001>

<bundles_post_ra>
// kernel: focus_forward.1
= control target key start
LH: loop header
LB: loop body
LE: loop exit
PB: predicated region body
PF: predicated region fallthrough
CT: control target
= control target key end

     0   :  { %s529_s12 = smov 0   ;;  %s531_s13 = smov 0   ;;  %s594_s0 = inlined_call_operand.vmem [shape: f32[32,16], index: 0, kind: input, shape index: {}]   ;;  %s595_s1 = inlined_call_operand.vmem [shape: f32[32,1], index: 1, kind: input, shape index: {}]   ;;  %s596_s2 = inlined_call_operand.vmem [shape: f32[2,16,64], index: 2, kind: input, shape index: {}]   ;;  %s597_s3 = inlined_call_operand.vmem [shape: f32[2,32,64], index: 3, kind: output, shape index: {}]  }
   0x1   :  { %s533_s14 = smov 0  }
   0x2 LB: > { %s22_s15 = sadd.s32 1, %s502_s13  ;;  %p422_p0 = scmp.ge.s32.totalorder %s506_s14, 1  ;;  %s506_s14 = sphi %s533_s14, %s13_s14   ;;  %s502_s13 = sphi %s531_s13, %s599_s13   ;;  %s498_s12 = sphi %s529_s12, %s598_s12  }
   0x3   : > { %p23_p1 = scmp.ge.s32.totalorder %s22_s15, 2  ;;  %p156_p2 = scmp.lt.s32.totalorder %s506_s14, 3 }
   0x5   : > { %s601_s15 = smov (%p23_p1, %s22_s15), 0  ;;  %p157_p3 = pnand %p422_p0, %p156_p2 }
   0x6   : > { %p186_p4 = scmp.lt.s32.totalorder (!%p157_p3), %s498_s12, 1  ;;  %v202_v0 = vld [vmem:[%s594_s0] sm:$0xff] (!%p157_p3)  ;;  %vm232_vm0 = vcmask (!%p157_p3), 130048   ;;  %v204_v1 = vld [vmem:[%s594_s0 + $0x10] sm:$0xff] (!%p157_p3)  ;;  %v508_v4 = vmov (!%p157_p3), 0   ;;  %v211_v5 = vld [vmem:[%s595_s1 + $0x18] sm:$0xff] (!%p157_p3) }
   0x7   : > { %160 = sbr.rel (%p157_p3) target bundleno = 240 (0xf0), region = 32  ;;  %445 = vmatprep.mubr.msk.f32.mxu0 (!%p157_p3), %vm232_vm0, %v202_v0  ;;  %448 = vmatprep.mubr.msk.f32.mxu1 (!%p157_p3), %vm232_vm0, %v204_v1  ;;  %v210_v2 = vld [vmem:[%s595_s1 + $0x10] sm:$0xff] (!%p157_p3)  ;;  %v208_v3 = vld [vmem:[%s595_s1] sm:$0xff] (!%p157_p3)  ;;  %v209_v6 = vld [vmem:[%s595_s1 + $0x8] sm:$0xff] (!%p157_p3)  ;;  %vm330_vm1 = vcmask (!%p157_p3), 523264  }
   0x8   : > { %483 = vset.pattern.permute.xlu1 (!%p157_p3), %v508_v4  ;;  %482 = vset.pattern.permute.xlu0 (!%p157_p3), %v508_v4  ;;  %v203_v10 = vld [vmem:[%s594_s0 + $0x8] sm:$0xff] (!%p157_p3)  ;;  %v205_v11 = vld [vmem:[%s594_s0 + $0x18] sm:$0xff] (!%p157_p3) }
   0x9   : > { %224 = vperm.xlu1 (!%p157_p3), %483, %v210_v2   ;;  %214 = vperm.xlu0 (!%p157_p3), %482, %v208_v3  }
   0xd   : > { %229 = vperm.xlu1 (!%p157_p3), %483, %v211_v5   ;;  %219 = vperm.xlu0 (!%p157_p3), %482, %v209_v6  }
   0xe   : > { %s603_s12 = smov (!%p186_p4, %s498_s12), 1 }
   0xf   : > { %s433_s24 = sshll.u32 %s603_s12, 4  ;;  %s434_s9 = sshll.u32 %s603_s12, 5 }
  0x10   : > { %s193_s4 = scalar_lea.vmem %s596_s2, %s433_s24  ;;  %s201_s16 = scalar_lea.vmem %s597_s3, %s434_s9 }
  0x11   : > { %v206_v7 = vld [vmem:[%s193_s4] sm:$0xff]  ;;  %v207_v8 = vld [vmem:[%s193_s4 + $0x8] sm:$0xff] }
  0x12   : > { %v451_v9 = vpack.c.bf16 %v207_v8, %v206_v7 }
  0x14   : > { %452 = vmatprep.subr.bf16.mxu0 %v451_v9  ;;  %455 = vmatprep.subr.bf16.mxu1 %v451_v9 }
  0x15   : > { %454 = vmatpush3.bf16.msra.mxu0 %v451_v9  ;;  %456 = vmatpush3.bf16.msra.mxu1 %v451_v9 }
  0x18   : > { %446 = vmatmul.mubr.msk.f32.vlgmr.msra.gmra.mrb[0].mxu0 %vm232_vm0, %v203_v10  ;;  %449 = vmatmul.mubr.msk.f32.vlgmr.msra.gmra.mrb[0].mxu1 %vm232_vm0, %v205_v11 }
  0x88   : > { %v225_v12 = vpop.permute.xlu1 %224  ;;  %v215_v13 = vpop.permute.xlu0 %214 }
  0x8c   : > { %v230_v14 = vpop.permute.xlu1 %229  ;;  %v220_v15 = vpop.permute.xlu0 %219 }
  0xeb   : > { %v447_v16 = vpop.f32.mrb[0].mxu0  ;;  %v450_v17 = vpop.f32.mrb[0].mxu1 }
  0xec   : > { %v317_v18 = vadd.f32 %v447_v16, %v220_v15  ;;  %v327_v19 = vadd.f32 %v450_v17, %v230_v14  ;;  %v311_v20 = vpop.f32.mrb[1].mxu0  ;;  %v321_v21 = vpop.f32.mrb[1].mxu1 }
  0xed   : > { %v312_v22 = vadd.f32 %v311_v20, %v215_v13  ;;  %v322_v23 = vadd.f32 %v321_v21, %v225_v12 }
  0xee   : > { %332 = vst.msk [vmem:[%s201_s16 + $0x8] sm:$0xff] %vm330_vm1, %v317_v18  ;;  %334 = vst.msk [vmem:[%s201_s16 + $0x18] sm:$0xff] %vm330_vm1, %v327_v19 }
  0xef   : > { %331 = vst.msk [vmem:[%s201_s16] sm:$0xff] %vm330_vm1, %v312_v22  ;;  %333 = vst.msk [vmem:[%s201_s16 + $0x10] sm:$0xff] %vm330_vm1, %v322_v23 }
  0xf0 PF: > { %s13_s14 = sadd.s32 1, %s506_s14   ;;  %s598_s12 = smov %s502_s13 }
  0xf1   : > { %p10_p5 = scmp.ge.s32.totalorder %s13_s14, 4   ;;  %s599_s13 = smov %s601_s15 }
  0xf3   :  { %12 = sbr.rel (!%p10_p5) target bundleno = 2 (0x2), region = 62 }

</bundles_post_ra>
